<compile_context>
chip_gen: v5e
topology: v5e:2x2
jax: 0.10.0
libtpu: 0.0.40
codegen_flags: <defaults>
</compile_context>

<pallas_src>
import functools

import jax
import jax.numpy as jnp
from jax.experimental import pallas as pl
from jax.experimental.pallas import tpu as pltpu


def _focal_kernel(logits_ref, tgt_ref, out_ref, *, alpha, gamma, ignore_index,
                  total_rows, needs_edge_mask):
    x = logits_ref[...].astype(jnp.float32)           # (C, R, 128) classes x pixel-rows x lanes
    t = tgt_ref[...]                                    # (R, 128) int32
    C, R, L = x.shape

    valid = t != ignore_index                           # (R, 128) bool
    if needs_edge_mask:
        # Only compiled in when block_rows does not divide HW/128: the last (ragged) block
        # reads past the pixel range, so zero the garbage rows before exp()/max().
        p = pl.program_id(1)
        row = jax.lax.broadcasted_iota(jnp.int32, (R, L), 0) + p * R
        in_range = row < total_rows
        valid = jnp.logical_and(valid, in_range)
        x = jnp.where(in_range[None, :, :], x, 0.0)

    # Numerically-stable logsumexp over the (leading) class axis: pure VPU, no XLU.
    m = jnp.max(x, axis=0, keepdims=True)                       # (1, R, 128)
    lse = jnp.log(jnp.sum(jnp.exp(x - m), axis=0)) + m[0]       # (R, 128)

    # Target-class logit: select-and-sum over classes; (C,1,1) iota broadcasts in the compare.
    cls = jax.lax.broadcasted_iota(jnp.int32, (C, 1, 1), 0)
    tgt_logit = jnp.sum(jnp.where(cls == t[None, :, :], x, 0.0), axis=0)   # (R, 128)

    # CE with reduction='none' semantics: 0 at ignored / padded pixels.
    ce = jnp.where(valid, lse - tgt_logit, 0.0)

    # Focal modulation, specialized at trace time (avoids EUP pow for common gammas and
    # sidesteps pow(0, 0) / pow(tiny-negative, fractional) edge cases).
    if gamma == 0.0:
        focal = ce
    else:
        pt = jnp.exp(-ce)
        base = jnp.maximum(1.0 - pt, 0.0)   # clamp: rounding can make ce slightly negative
        if float(gamma).is_integer() and 0 < gamma <= 8:
            mod = base
            for _ in range(int(gamma) - 1):
                mod = mod * base
        else:
            mod = jnp.power(base, gamma)
        focal = mod * ce
    if alpha != 1.0:
        focal = focal * jnp.float32(alpha)

    # Per-block partial sums as one lane-dense (8, 128) tile (summed by the caller).
    if R % 8 == 0:
        out_ref[...] = jnp.sum(focal.reshape(R // 8, 8, L), axis=0)
    else:
        s = jnp.sum(focal, axis=0, keepdims=True)                # (1, 128)
        rows8 = jax.lax.broadcasted_iota(jnp.int32, (8, L), 0)
        out_ref[...] = jnp.where(rows8 == 0, s, 0.0)


def _pick_block_rows(hw128, C, N, target_bytes=4 << 20):
    """Pick block_rows so the f32-equivalent logits tile is ~target_bytes, preferring a
    divisor of hw128 (no edge masking). Returns (block_rows, needs_edge_mask)."""
    rows_budget = max(8, target_bytes // (C * 128 * 4))
    limit = min(rows_budget, hw128)
    best = 0
    for d in range(8, limit + 1, 8):       # largest multiple-of-8 divisor within budget
        if hw128 % d == 0:
            best = d
    if best:
        # v7x has two TensorCores sharing HBM: keep >= 2 grid steps when N == 1.
        if N == 1 and best == hw128 and hw128 >= 16:
            for d in range(((hw128 // 2) // 8) * 8, 7, -8):
                if hw128 % d == 0:
                    best = d
                    break
        return best, False
    if hw128 <= rows_budget:
        return hw128, False                # full-dim block (tiny images); no mask needed
    rows = max(8, (limit // 8) * 8)        # ragged fallback: last block keeps the edge mask
    return rows, (hw128 % rows != 0)


def focal_loss_pallas(inputs, targets, *, alpha=1.0, gamma=0.0,
                      size_average=True, ignore_index=255,
                      block_rows=None, logits_buffers=None):
    """inputs: (N, C, H, W) float logits; targets: (N, H, W) int class ids."""
    N, C, H, W = inputs.shape
    HW = H * W
    P = N * HW  # torch .mean() divides by ALL pixels (ignored included)

    # Zero-copy re-views (no transpose); keep the producer's dtype (bf16 passes through).
    if HW % 128 == 0:
        logits = inputs.reshape(N, C, HW)
        tgt = targets.reshape(N, HW)
    else:
        # TODO(synk): ragged H*W (not a multiple of 128) falls back to one pad copy;
        # padded pixels get ignore_index (and zero logits), so they contribute 0.
        pad = 128 - HW % 128
        logits = jnp.pad(inputs.reshape(N, C, HW), ((0, 0), (0, 0), (0, pad)))
        tgt = jnp.pad(targets.reshape(N, HW), ((0, 0), (0, pad)),
                      constant_values=ignore_index)
    HW_pad = logits.shape[-1]
    HW128 = HW_pad // 128
    logits = logits.reshape(N, C, HW128, 128)
    # TODO(synk): for small C, targets could ship as int16/uint8 to cut HBM bytes on v5e
    # (needs (16,128)/(32,128) packed tiling); kept int32 for portability.
    tgt = tgt.reshape(N, HW128, 128).astype(jnp.int32)

    if block_rows is None:
        block_rows, needs_edge_mask = _pick_block_rows(HW128, C, N)
    else:
        block_rows = min(int(block_rows), HW128)
        if block_rows != HW128:
            block_rows = max(8, (block_rows // 8) * 8)
        needs_edge_mask = (HW128 % block_rows != 0)
    grid_p = pl.cdiv(HW128, block_rows)

    # Explicit VMEM budget: double-buffered input tiles + generous headroom for the f32
    # compute intermediates, >= 32 MiB (covers v5e's 16 MiB scoped default) but kept below
    # physical VMEM (important on v7x: 64 MiB).
    elem = inputs.dtype.itemsize
    logits_tile = C * block_rows * 128 * elem
    tgt_tile = block_rows * 128 * 4
    est = (2 * logits_tile + 2 * tgt_tile + 2 * 8 * 128 * 4
           + 4 * C * block_rows * 128 * 4)
    try:
        vmem_cap = int(pltpu.get_tpu_info().vmem_capacity_bytes)
    except Exception:
        vmem_cap = 64 << 20
    vmem_limit = int(min(max(est, 32 << 20), max(32 << 20, (vmem_cap * 3) // 4)))
    # TODO(synk): C >~ 2000 should add a C-chunk grid axis with an online logsumexp
    # accumulator to stay within v7x VMEM; current shapes never get near that.

    kernel = functools.partial(
        _focal_kernel,
        alpha=float(alpha), gamma=float(gamma), ignore_index=int(ignore_index),
        total_rows=HW128, needs_edge_mask=bool(needs_edge_mask))

    logits_spec_kwargs = {}
    if logits_buffers is not None and int(logits_buffers) != 2:
        # Optional deeper pipelining if profiling shows exposed (strided) DMA.
        logits_spec_kwargs["pipeline_mode"] = pl.Buffered(int(logits_buffers))

    partials = pl.pallas_call(
        kernel,
        out_shape=jax.ShapeDtypeStruct((N, grid_p * 8, 128), jnp.float32),
        grid_spec=pltpu.PrefetchScalarGridSpec(
            num_scalar_prefetch=0,
            grid=(N, grid_p),
            in_specs=[
                pl.BlockSpec((None, C, block_rows, 128), lambda n, p: (n, 0, p, 0),
                             **logits_spec_kwargs),
                pl.BlockSpec((None, block_rows, 128), lambda n, p: (n, p, 0)),
            ],
            out_specs=pl.BlockSpec((None, 8, 128), lambda n, p: (n, p, 0)),
        ),
        compiler_params=pltpu.CompilerParams(
            dimension_semantics=("parallel", "parallel"),
            vmem_limit_bytes=vmem_limit),
    )(logits, tgt)

    total = jnp.sum(partials)
    if size_average:
        return total / jnp.float32(P)
    return total


def _focal_loss_ref(inputs, targets, *, alpha=1.0, gamma=0.0,
                    size_average=True, ignore_index=255):
    # Pure-JAX reference mirroring the PyTorch module.
    N, C, H, W = inputs.shape
    logits = jnp.transpose(inputs, (0, 2, 3, 1)).reshape(-1, C).astype(jnp.float32)
    tgt = targets.reshape(-1).astype(jnp.int32)
    lse = jax.nn.logsumexp(logits, axis=-1)
    safe_t = jnp.where(tgt == ignore_index, 0, tgt)
    tgt_logit = jnp.take_along_axis(logits, safe_t[:, None], axis=-1)[:, 0]
    ce = jnp.where(tgt == ignore_index, 0.0, lse - tgt_logit)
    pt = jnp.exp(-ce)
    fl = alpha * jnp.power(1.0 - pt, gamma) * ce
    return fl.mean() if size_average else fl.sum()


if __name__ == "__main__":
    key = jax.random.PRNGKey(0)
    k1, k2, k3, k4 = jax.random.split(key, 4)

    # Small NCHW case: gamma = 0 (plain CE) mean, and gamma = 2 sum.
    N, C, H, W = 2, 4, 16, 16
    x = jax.random.normal(k1, (N, C, H, W), dtype=jnp.float32)
    t = jax.random.randint(k2, (N, H, W), 0, C, dtype=jnp.int32)
    t = t.at[0, 0, :4].set(255)   # exercise ignore_index masking

    out0 = jax.block_until_ready(
        focal_loss_pallas(x, t, alpha=1.0, gamma=0.0, size_average=True, ignore_index=255))
    ref0 = _focal_loss_ref(x, t, alpha=1.0, gamma=0.0, size_average=True, ignore_index=255)
    assert jnp.allclose(out0, ref0, rtol=1e-5, atol=1e-5), (out0, ref0)

    out2 = jax.block_until_ready(
        focal_loss_pallas(x, t, alpha=0.5, gamma=2.0, size_average=False, ignore_index=255))
    ref2 = _focal_loss_ref(x, t, alpha=0.5, gamma=2.0, size_average=False, ignore_index=255)
    assert jnp.allclose(out2, ref2, rtol=1e-5, atol=1e-5), (out2, ref2)

    # Ragged case (H*W not a multiple of 128, non-dividing block_rows): exercises the
    # pad path and the edge-mask fallback kernel variant.
    N2, C2, H2, W2 = 1, 3, 40, 40
    x2 = jax.random.normal(k3, (N2, C2, H2, W2), dtype=jnp.float32)
    t2 = jax.random.randint(k4, (N2, H2, W2), 0, C2, dtype=jnp.int32)
    t2 = t2.at[0, 5, :7].set(255)
    out3 = jax.block_until_ready(
        focal_loss_pallas(x2, t2, alpha=1.0, gamma=2.0, size_average=True,
                          ignore_index=255, block_rows=8))
    ref3 = _focal_loss_ref(x2, t2, alpha=1.0, gamma=2.0, size_average=True, ignore_index=255)
    assert jnp.allclose(out3, ref3, rtol=1e-5, atol=1e-5), (out3, ref3)

    print("KERNEL_OK")
</pallas_src>

<mosaic_0001>
module attributes {stable_mosaic.version = 11 : i64} {
  func.func @_focal_kernel(%arg0: i32, %arg1: i32, %arg2: memref<1x4x2x128xf32, #tpu.memory_space<vmem>>, %arg3: memref<1x2x128xi32, #tpu.memory_space<vmem>>, %arg4: memref<1x8x128xf32, #tpu.memory_space<vmem>>) attributes {dimension_semantics = [#tpu.dimension_semantics<parallel>, #tpu.dimension_semantics<parallel>], iteration_bounds = array<i64: 2, 1>, scalar_prefetch = 0 : i64, scratch_operands = 0 : i64, tpu.core_type = #tpu.core_type<tc>, window_params = [{transform_indices = @transform_0, window_bounds = array<i64: 1, 4, 2, 128>}, {transform_indices = @transform_1, window_bounds = array<i64: 1, 2, 128>}, {transform_indices = @transform_2, window_bounds = array<i64: 1, 8, 128>}]} {
    %c0 = arith.constant 0 : index
    %c0_0 = arith.constant 0 : index
    %c0_1 = arith.constant 0 : index
    %c0_2 = arith.constant 0 : index
    %0 = vector.load %arg2[%c0, %c0_0, %c0_1, %c0_2] : memref<1x4x2x128xf32, #tpu.memory_space<vmem>>, vector<1x4x2x128xf32>
    %1 = vector.shape_cast %0 : vector<1x4x2x128xf32> to vector<4x2x128xf32>
    %c0_3 = arith.constant 0 : index
    %c0_4 = arith.constant 0 : index
    %c0_5 = arith.constant 0 : index
    %2 = vector.load %arg3[%c0_3, %c0_4, %c0_5] : memref<1x2x128xi32, #tpu.memory_space<vmem>>, vector<1x2x128xi32>
    %3 = vector.shape_cast %2 : vector<1x2x128xi32> to vector<2x128xi32>
    %c255_i32 = arith.constant 255 : i32
    %4 = vector.broadcast %c255_i32 : i32 to vector<2x128xi32>
    %5 = arith.cmpi ne, %3, %4 : vector<2x128xi32>
    %cst = arith.constant dense<0xFF800000> : vector<2x128xf32>
    %6 = vector.multi_reduction <maximumf>, %1, %cst [0] : vector<4x2x128xf32> to vector<2x128xf32>
    %7 = vector.shape_cast %6 : vector<2x128xf32> to vector<1x2x128xf32>
    %8 = vector.broadcast %7 : vector<1x2x128xf32> to vector<4x2x128xf32>
    %9 = arith.subf %1, %8 : vector<4x2x128xf32>
    %10 = math.exp %9 : vector<4x2x128xf32>
    %cst_6 = arith.constant dense<0.000000e+00> : vector<2x128xf32>
    %11 = vector.multi_reduction <add>, %10, %cst_6 [0] : vector<4x2x128xf32> to vector<2x128xf32>
    %12 = math.log %11 : vector<2x128xf32>
    %13 = vector.shape_cast %7 : vector<1x2x128xf32> to vector<2x128xf32>
    %14 = arith.addf %12, %13 : vector<2x128xf32>
    %15 = tpu.iota {dimensions = array<i32: 0>} : vector<4x1x1xi32>
    %16 = vector.shape_cast %3 : vector<2x128xi32> to vector<1x2x128xi32>
    %17 = vector.broadcast %15 : vector<4x1x1xi32> to vector<4x2x128xi32>
    %18 = vector.broadcast %16 : vector<1x2x128xi32> to vector<4x2x128xi32>
    %19 = arith.cmpi eq, %17, %18 : vector<4x2x128xi32>
    %cst_7 = arith.constant 0.000000e+00 : f32
    %20 = vector.broadcast %cst_7 : f32 to vector<4x2x128xf32>
    %21 = arith.select %19, %1, %20 : vector<4x2x128xi1>, vector<4x2x128xf32>
    %cst_8 = arith.constant dense<0.000000e+00> : vector<2x128xf32>
    %22 = vector.multi_reduction <add>, %21, %cst_8 [0] : vector<4x2x128xf32> to vector<2x128xf32>
    %23 = arith.subf %14, %22 : vector<2x128xf32>
    %cst_9 = arith.constant 0.000000e+00 : f32
    %24 = vector.broadcast %cst_9 : f32 to vector<2x128xf32>
    %25 = arith.select %5, %23, %24 : vector<2x128xi1>, vector<2x128xf32>
    %cst_10 = arith.constant dense<0.000000e+00> : vector<128xf32>
    %26 = vector.multi_reduction <add>, %25, %cst_10 [0] : vector<2x128xf32> to vector<128xf32>
    %27 = vector.shape_cast %26 : vector<128xf32> to vector<1x128xf32>
    %28 = tpu.iota {dimensions = array<i32: 0>} : vector<8x128xi32>
    %c0_i32 = arith.constant 0 : i32
    %29 = vector.broadcast %c0_i32 : i32 to vector<8x128xi32>
    %30 = arith.cmpi eq, %28, %29 : vector<8x128xi32>
    %cst_11 = arith.constant 0.000000e+00 : f32
    %31 = vector.shape_cast %27 : vector<1x128xf32> to vector<1x128xf32>
    %32 = vector.broadcast %31 : vector<1x128xf32> to vector<8x128xf32>
    %33 = vector.broadcast %cst_11 : f32 to vector<8x128xf32>
    %34 = arith.select %30, %32, %33 : vector<8x128xi1>, vector<8x128xf32>
    %c0_12 = arith.constant 0 : index
    %c0_13 = arith.constant 0 : index
    %c0_14 = arith.constant 0 : index
    %35 = vector.load %arg4[%c0_12, %c0_13, %c0_14] : memref<1x8x128xf32, #tpu.memory_space<vmem>>, vector<1x8x128xf32>
    %36 = vector.shape_cast %35 : vector<1x8x128xf32> to vector<8x128xf32>
    %37 = vector.shape_cast %34 : vector<8x128xf32> to vector<1x8x128xf32>
    tpu.vector_store %arg4[%c0_12, %c0_13, %c0_14], %37 {strides = array<i32>} : memref<1x8x128xf32, #tpu.memory_space<vmem>>, vector<1x8x128xf32>,
    return
  }
  func.func @transform_0(%arg0: i32, %arg1: i32) -> (i32, i32, i32, i32) {
    %c0_i32 = arith.constant 0 : i32
    %c0_i32_0 = arith.constant 0 : i32
    %c0_i32_1 = arith.constant 0 : i32
    return %arg0, %c0_i32, %arg1, %c0_i32_0 : i32, i32, i32, i32
  }
  func.func @transform_1(%arg0: i32, %arg1: i32) -> (i32, i32, i32) {
    %c0_i32 = arith.constant 0 : i32
    %c0_i32_0 = arith.constant 0 : i32
    return %arg0, %arg1, %c0_i32 : i32, i32, i32
  }
  func.func @transform_2(%arg0: i32, %arg1: i32) -> (i32, i32, i32) {
    %c0_i32 = arith.constant 0 : i32
    %c0_i32_0 = arith.constant 0 : i32
    return %arg0, %arg1, %c0_i32 : i32, i32, i32
  }
}

</mosaic_0001>

<bundles_post_ra>
// kernel: tpu_custom_call.1
= control target key start
LH: loop header
LB: loop body
LE: loop exit
PB: predicated region body
PF: predicated region fallthrough
CT: control target
= control target key end

     0   :  { %7 = vsyncpa [#allocation3], 0  ;;  %s827_s0 = inlined_call_operand.hbm [shape: f32[2,4,2,128], index: 0, kind: input, shape index: {}]   ;;  %s828_s1 = inlined_call_operand.hbm [shape: s32[2,2,128], index: 1, kind: input, shape index: {}]   ;;  %s829_s2 = inlined_call_operand.hbm [shape: f32[2,8,128], index: 2, kind: output, shape index: {}]  }
   0x1   :  { %9 = vsyncpa [#allocation3 + $0x1], 0 }
   0x2   :  { %10 = vsyncpa [#allocation6], 0 }
   0x3   :  { %12 = vsyncpa [#allocation6 + $0x1], 0 }
   0x4   :  { %13 = vsyncpa [#allocation4], 0 }
   0x5   :  { %15 = vsyncpa [#allocation4 + $0x1], 0  ;;  %s672_s9 = smov 0   ;;  %s674_s10 = smov 0  }
   0x6   :  { %s676_s11 = smov 0   ;;  %s678_s12 = smov 0  }
   0x7   :  { %s680_s13 = smov 0   ;;  %s682_s14 = smov 0  }
   0x8 LB: > { %s410_s15 = sadd.s32 4294967295, %s653_s14   ;;  %s411_s16 = sadd.s32 4294967294, %s653_s14   ;;  %s653_s14 = sphi %s682_s14, %s21_s14   ;;  %s649_s13 = sphi %s680_s13, %s839_s13   ;;  %s645_s12 = sphi %s678_s12, %s838_s12   ;;  %s641_s11 = sphi %s676_s11, %s837_s11   ;;  %s637_s10 = sphi %s674_s10, %s836_s10   ;;  %s633_s9 = sphi %s672_s9, %s835_s9  }
   0x9   : > { %s33_s17 = sadd.s32 1, %s649_s13  ;;  %s42_s18 = sadd.s32 1, %s641_s11 }
   0xa   : > { %p35_p0 = scmp.ge.s32.totalorder %s33_s17, 2  ;;  %p49_p1 = scmp.ne.s32.totalorder %s641_s11, %s637_s10 }
   0xb   : > { %p50_p2 = scmp.eq.s32.totalorder %s653_s14, 0  ;;  %p55_p3 = scmp.ne.s32.totalorder %s637_s10, %s633_s9 }
   0xc   : > { %s841_s17 = smov (%p35_p0, %s33_s17), 0  ;;  %p56_p5 = scmp.eq.s32.totalorder %s410_s15, 0 }
   0xd   : > { %p713_p4 = por %p50_p2, %p49_p1  ;;  %s37_s20 = ssub.s32 %s649_s13, %s841_s17 }
   0xe   : > { %p109_p6 = scmp.eq.s32.totalorder %s410_s15, 1  ;;  %p40_p7 = scmp.eq.s32.totalorder %s37_s20, 0 }
   0xf   : > { %p719_p8 = por %p56_p5, %p55_p3  ;;  %p115_p10 = scmp.eq.s32.totalorder %s411_s16, 1 }
  0x10   : > { %p723_p9 = por %p109_p6, %p49_p1  ;;  %p413_p12 = scmp.ge.s32.totalorder %s653_s14, 2 }
  0x11   : > { %s728_s23 = scalar_select %p40_p7, %s641_s11, %s42_s18  }
  0x12   : > { %p730_p11 = por %p115_p10, %p55_p3  ;;  %p445_p13 = scmp.lt.s32.totalorder %s653_s14, 2 }
  0x13   : > { %s135_s25 = sand.u32 1, %s641_s11   ;;  %s427_s27 = sshll.u32 %s649_s13, 3 }
  0x14   : > { %s414_s26 = sshll.u32 %s135_s25, 3  ;;  %s145_s30 = scalar_lea.hbm %s827_s0, %s427_s27 }
  0x15   : > { %s139_s3 = scalar_lea.vmem [#allocation2], %s414_s26  ;;  %s146_s5 = sshll.u32 %s145_s30, 4  ;;  %s147_s5 = int_to_ptr.hbm [resolvable:$true] %s146_s5 }
  0x16   : > { %s148_s4 = sshll.u32 %s139_s3, 4  ;;  %p743_p0 = pnand %p445_p13, %p713_p4  ;;  %s149_s4 = int_to_ptr.vmem [resolvable:$true] %s148_s4 }
  0x17   : > { %p419_p1 = scmp.ge.s32.totalorder %s653_s14, 1  ;;  %s136_s7 = scalar_lea.sflag [#allocation3], %s135_s25 }
  0x18   : > { %s655_s8 = smov 32   ;;  %s656_s15 = smov 2  }
  0x19   : > { %437 = dma.hbm_to_vmem [thread:$0]  (!%p743_p0), %s147_s5, 128, %s149_s4, %s136_s7, %s655_s8, %s655_s8, %s656_s15  }
  0x1a   : > { %p176_p2 = scmp.lt.s32.totalorder %s653_s14, 3  ;;  %s417_s16 = sshll.u32 %s135_s25, 1 }
  0x1b   : > { %s418_s18 = sshll.u32 %s649_s13, 1  ;;  %s162_s27 = scalar_lea.vmem [#allocation5], %s417_s16 }
  0x1c   : > { %p177_p3 = pnand %p419_p1, %p176_p2  ;;  %s167_s19 = scalar_lea.hbm %s828_s1, %s418_s18 }
  0x1d   : > { %s171_s28 = sshll.u32 %s162_s27, 4  ;;  %s169_s29 = sshll.u32 %s167_s19, 4  ;;  %s172_s28 = int_to_ptr.vmem [resolvable:$true] %s171_s28  ;;  %s170_s29 = int_to_ptr.hbm [resolvable:$true] %s169_s29 }
  0x1e   : > { %s159_s30 = scalar_lea.sflag [#allocation6], %s135_s25  ;;  %180 = sbr.rel (%p177_p3) target bundleno = 96 (0x60), region = 28 }
  0x1f   : > { %440 = dma.hbm_to_vmem [thread:$0]  (!%p743_p0), %s170_s29, 32, %s172_s28, %s159_s30  }
  0x20   : > { %s758_s3 = sand.u32 (!%p177_p3), 1, %s637_s10  }
  0x21   : > { %s420_s4 = sshll.u32 (!%p177_p3), %s758_s3, 3  ;;  %s183_s5 = scalar_lea.sflag (!%p177_p3), [#allocation3], %s758_s3 }
  0x22   : > { %s186_s7 = scalar_lea.vmem (!%p177_p3), [#allocation2], %s420_s4 }
  0x23   : > { %620 = dma.done.wait (%p719_p8), %s183_s5, 128  }
  0x24   : > { %622 = vsyncadd (%p719_p8), %s183_s5, 4294967168  ;;  %s421_s25 = sshll.u32 %s758_s3, 1  ;;  %s193_s6 = scalar_lea.sflag [#allocation6], %s758_s3 }
  0x25   : > { %s196_s8 = scalar_lea.vmem [#allocation5], %s421_s25 }
  0x26   : > { %624 = dma.done.wait (%p719_p8), %s193_s6, 32  }
  0x27   : > { %626 = vsyncadd (%p719_p8), %s193_s6, 4294967264  ;;  %vm229_vm0 = vcmask 1041408   ;;  %v223_v0 = vld [vmem:[%s186_s7] sm:$0x3]  ;;  %v224_v1 = vld [vmem:[%s186_s7 + $0x2] sm:$0x3]  ;;  %v283_v49 = vlaneseq }
  0x28   : > { %v225_v2 = vld [vmem:[%s186_s7 + $0x4] sm:$0x3]  ;;  %v226_v3 = vld [vmem:[%s186_s7 + $0x6] sm:$0x3]  ;;  %v230_v4 = vsel %vm229_vm0, %v223_v0, -inf  ;;  %v231_v5 = vsel %vm229_vm0, %v224_v1, -inf }
  0x29   : > { %v232_v6 = vsel %vm229_vm0, %v225_v2, -inf  ;;  %v233_v7 = vsel %vm229_vm0, %v226_v3, -inf  ;;  %v234_v8 = vmax.f32 %v230_v4, %v231_v5  ;;  %v227_v19 = vld [vmem:[%s196_s8] sm:$0x3]  ;;  %s424_s21 = sshll.u32 %s645_s12, 3  ;;  %v284_v52 = vshrl.u32 %v283_v49, 7 }
  0x2a   : > { %v235_v9 = vmax.f32 %v232_v6, %v233_v7  ;;  %vm259_vm1 = vcmp.eq.s32.totalorder %v227_v19, 0  ;;  %vm260_vm2 = vcmp.eq.s32.totalorder %v227_v19, 1  ;;  %vm261_vm3 = vcmp.eq.s32.totalorder %v227_v19, 2  ;;  %s300_s18 = scalar_lea.hbm %s829_s2, %s424_s21  ;;  %s222_s20 = scalar_lea.vmem [#allocation7], %s420_s4 }
  0x2b   : > { %v263_v25 = vsel %vm259_vm1, %v223_v0, 0.0  ;;  %v264_v26 = vsel %vm260_vm2, %v224_v1, 0.0  ;;  %v265_v34 = vsel %vm261_vm3, %v225_v2, 0.0  ;;  %vm262_vm4 = vcmp.eq.s32.totalorder %v227_v19, 3  ;;  %s302_s26 = sshll.u32 %s222_s20, 4  ;;  %s304_s19 = sshll.u32 %s300_s18, 4  ;;  %s303_s26 = int_to_ptr.vmem [resolvable:$true] %s302_s26  ;;  %s305_s19 = int_to_ptr.hbm [resolvable:$true] %s304_s19 }
  0x2c   : > { %v236_v10 = vmax.f32 %v234_v8, %v235_v9  ;;  %v267_v32 = vsel %vm229_vm0, %v263_v25, 0.0  ;;  %v268_v33 = vsel %vm229_vm0, %v264_v26, 0.0  ;;  %v270_v37 = vsel %vm229_vm0, %v265_v34, 0.0  ;;  %s289_s12 = scalar_lea.sflag [#allocation4], %s758_s3  ;;  %s581_s27 = sshra.s32 %s305_s19, 4  ;;  %s582_s27 = int_to_ptr.hbm [resolvable:$true] %s581_s27 }
  0x2d   : > { %v269_v36 = vadd.f32 %v268_v33, %v267_v32  ;;  %v266_v38 = vsel %vm262_vm4, %v226_v3, 0.0  ;;  %vm228_vm5 = vcmp.ne.s32.totalorder %v227_v19, 255  ;;  %vm285_vm6 = vcmp.eq.s32.totalorder %v284_v52, 0  ;;  %s583_s28 = scalar_lea.hbm %s582_s27, 8  ;;  %s587_s4 = scalar_lea.hbm %s829_s2, 16 }
  0x2e   : > { %v237_v11 = vsub.f32 %v223_v0, %v236_v10  ;;  %v238_v12 = vsub.f32 %v224_v1, %v236_v10  ;;  %v239_v13 = vsub.f32 %v225_v2, %v236_v10  ;;  %v240_v14 = vsub.f32 %v226_v3, %v236_v10  ;;  %p584_p4 = scmp.ne.s32.totalorder %s582_s27, %s583_s28  ;;  %p588_p7 = scmp.lt.s32.totalorder %s582_s27, %s829_s2 }
  0x2f   : > { %v271_v39 = vadd.f32 %v270_v37, %v269_v36  ;;  %v272_v40 = vsel %vm229_vm0, %v266_v38, 0.0  ;;  %p589_p8 = scmp.lt.s32.totalorder %s587_s4, %s583_s28 }
  0x30   : > { %v241_v15 = vmul.f32 1.442695, %v237_v11  ;;  %v243_v16 = vmul.f32 1.442695, %v238_v12  ;;  %v245_v17 = vmul.f32 1.442695, %v239_v13  ;;  %p585_p5 = pnand %p584_p4, %p723_p9 }
  0x31   : > { %v247_v18 = vmul.f32 1.442695, %v240_v14  ;;  %v273_v43 = vadd.f32 %v272_v40, %v271_v39  ;;  %p590_p10 = por %p589_p8, %p588_p7 }
  0x32   : > { %497 = vpow2.f32 %v241_v15  ;;  %p586_p6 = pneg %p585_p5 }
  0x33   : > { %499 = vpow2.f32 %v243_v16 }
  0x34   : > { %501 = vpow2.f32 %v245_v17  ;;  %p591_p13 = pnand %p590_p10, %p586_p6 }
  0x35   : > { %503 = vpow2.f32 %v247_v18 }
  0x38   : > { %v498_v20 = vpop.eup %497 }
  0x39   : > { %v500_v21 = vpop.eup %499  ;;  %v249_v22 = vsel %vm229_vm0, %v498_v20, 0.0 }
  0x3a   : > { %v502_v23 = vpop.eup %501  ;;  %v250_v24 = vsel %vm229_vm0, %v500_v21, 0.0 }
  0x3b   : > { %v504_v27 = vpop.eup %503  ;;  %v251_v28 = vadd.f32 %v250_v24, %v249_v22  ;;  %v252_v29 = vsel %vm229_vm0, %v502_v23, 0.0 }
  0x3c   : > { %v254_v30 = vsel %vm229_vm0, %v504_v27, 0.0 }
  0x3d   : > { %v253_v31 = vadd.f32 %v252_v29, %v251_v28 }
  0x3f   : > { %v255_v35 = vadd.f32 %v254_v30, %v253_v31 }
  0x41   : > { %505 = vlog2.f32 %v255_v35 }
  0x47   : > { %v506_v41 = vpop.eup %505 }
  0x48   : > { %v257_v42 = vmul.f32 0.6931472, %v506_v41 }
  0x4a   : > { %v258_v44 = vadd.f32 %v257_v42, %v236_v10 }
  0x4c   : > { %v274_v45 = vsub.f32 %v258_v44, %v273_v43 }
  0x4e   : > { %v275_v46 = vsel %vm228_vm5, %v274_v45, 0.0 }
  0x4f   : > { %v276_v47 = vsel %vm229_vm0, %v275_v46, 0.0 }
  0x50   : > { %v277_v48 = vrot.slane %v276_v47, 4 }
  0x52   : > { %v278_v50 = vadd.f32 %v277_v48, %v276_v47 }
  0x54   : > { %v279_v51 = vrot.slane %v278_v50, 2 }
  0x56   : > { %v280_v53 = vadd.f32 %v279_v51, %v278_v50 }
  0x58   : > { %v281_v54 = vrot.slane %v280_v53, 1 }
  0x5a   : > { %v282_v55 = vadd.f32 %v281_v54, %v280_v53 }
  0x5c   : > { %v286_v56 = vsel %vm285_vm6, %v282_v55, 0.0 }
  0x5d   : > { %287 = vst [vmem:[%s222_s20] sm:$0xff] %v286_v56 }
  0x5e   : > { %594 = shalt.err (!%p591_p13)
}
  0x5f   : > { %432 = dma.vmem_to_hbm [thread:$0]  (%p723_p9), %s303_s26, 128, %s305_s19, %s289_s12  }
  0x60 PF: > { %s316_s3 = sand.u32 1, %s633_s9   ;;  %p442_p0 = pnand %p413_p12, %p730_p11 }
  0x61   : > { %s317_s25 = scalar_lea.sflag [#allocation4], %s316_s3 }
  0x62   : > { %p443_p1 = pneg %p442_p0 }
  0x64   : > { %628 = dma.done.wait (%p443_p1), %s317_s25, 128  }
  0x65   : > { %630 = vsyncadd (%p443_p1), %s317_s25, 4294967168  ;;  %s21_s14 = sadd.s32 1, %s653_s14   ;;  %s835_s9 = smov %s637_s10 }
  0x66   : > { %p18_p2 = scmp.ge.s32.totalorder %s21_s14, 4   ;;  %s836_s10 = smov %s641_s11 }
  0x67   : > { %s837_s11 = smov %s728_s23  ;;  %s838_s12 = smov %s649_s13 }
  0x68   : > { %s839_s13 = smov %s841_s17  ;;  %20 = sbr.rel (!%p18_p2) target bundleno = 8 (0x8), region = 86 }
  0x6d   :  { %323 = vsyncpa [#allocation3], 1 }
  0x6e   :  { %325 = vsyncpa [#allocation3 + $0x1], 1 }
  0x6f   :  { %326 = vsyncpa [#allocation6], 1 }
  0x70   :  { %328 = vsyncpa [#allocation6 + $0x1], 1 }
  0x71   :  { %329 = vsyncpa [#allocation4], 1 }
  0x72   :  { %331 = vsyncpa [#allocation4 + $0x1], 1 }

</bundles_post_ra>
